<compile_context>
chip_gen: v7x
topology: tpu7x:2x2x1
jax: 0.10.0
libtpu: 0.0.40
codegen_flags: <defaults>
</compile_context>

<pallas_src>
import jax
import jax.numpy as jnp
from jax.experimental import pallas as pl
from jax.experimental.pallas import tpu as pltpu

_LANES = 128


def _make_smooth_l1_kernel(beta):
    beta_f = float(beta)
    half_over_beta = 0.5 / beta_f
    half_beta = 0.5 * beta_f

    def kernel(pred_ref, target_ref, out_ref):
        p = pred_ref[...].astype(jnp.float32)
        t = target_ref[...].astype(jnp.float32)
        diff = jnp.abs(p - t)
        loss = jnp.where(
            diff < beta_f,
            (half_over_beta * diff) * diff,
            diff - half_beta,
        )
        out_ref[...] = loss.astype(out_ref.dtype)

    return kernel


def _smooth_l1_jnp(pred, target, beta):
    """Plain-XLA fallback used only for tails / tiny inputs."""
    p = pred.astype(jnp.float32)
    t = target.astype(jnp.float32)
    diff = jnp.abs(p - t)
    out = jnp.where(diff < beta, (0.5 / beta) * diff * diff, diff - 0.5 * beta)
    return out.astype(pred.dtype)


def _round_up(x, m):
    return ((x + m - 1) // m) * m


def _round_down(x, m):
    return (x // m) * m


def smooth_l1_loss(pred, target, beta=1.0, *, tile_bytes=4 << 20,
                   xla_fallback_elems=0):
    """Elementwise smooth-L1 loss.

    tile_bytes: per-pipeline-buffer budget (4 MiB default -> ~24 MiB of scoped
        VMEM with 3 operands x 2 buffers, requested explicitly below).
    xla_fallback_elems: if >0, inputs smaller than this bypass pallas_call and
        use a fused XLA elementwise expression.  Default 0 so the Pallas path
        is always exercised (the benchmark harness measures this kernel).
    """
    assert beta > 0
    assert pred.shape == target.shape and pred.size > 0

    orig_shape = pred.shape
    dtype = pred.dtype
    n = int(pred.size)
    itemsize = jnp.dtype(dtype).itemsize
    # Sublane quantum for this dtype (f32: 8, bf16: 16, int8/fp8: 32).
    min_sub = max(8, 32 // itemsize)

    # Tiny inputs (< one 128-lane row) or explicit small-size opt-out: let XLA
    # fuse the elementwise expression instead of paying custom-call overhead.
    if n < _LANES or n < xla_fallback_elems:
        return _smooth_l1_jnp(pred, target, beta)

    pred_flat = pred.reshape(-1)      # contiguous flatten: zero-copy
    target_flat = target.reshape(-1)

    rows = n // _LANES                # number of complete 128-lane rows
    max_tile_rows = max(min_sub,
                        _round_down(tile_bytes // (_LANES * itemsize), min_sub))

    # Rows handled by the kernel (zero-copy reshape of the flat prefix).
    if rows % min_sub == 0 or rows <= max_tile_rows:
        # Either perfectly tileable, or small enough to be one full-array block
        # (the (8,128) rule is waived when block_shape == full array dims).
        rows_k = rows
    else:
        rows_k = _round_down(rows, min_sub)

    n_k = rows_k * _LANES

    # Tile rows.  Prefer >=2 grid steps so v7x's two TensorCores both get work
    # when dimension_semantics=("parallel",) shards the grid.
    if rows_k % min_sub == 0:
        tr = min(max_tile_rows, rows_k)
        if rows_k <= max_tile_rows and rows_k >= 2 * min_sub:
            tr = _round_up(pl.cdiv(rows_k, 2), min_sub)
    else:
        tr = rows_k  # single block equal to the full (rows_k, 128) array

    grid = (pl.cdiv(rows_k, tr),)

    # 2 inputs + 1 output, double-buffered by the auto-pipeline, + headroom.
    vmem_needed = 3 * 2 * tr * _LANES * itemsize
    vmem_limit = min(vmem_needed + (8 << 20), 48 << 20)

    pred2d = pred_flat[:n_k].reshape(rows_k, _LANES)
    target2d = target_flat[:n_k].reshape(rows_k, _LANES)

    out2d = pl.pallas_call(
        _make_smooth_l1_kernel(beta),
        out_shape=jax.ShapeDtypeStruct((rows_k, _LANES), dtype),
        grid_spec=pltpu.PrefetchScalarGridSpec(
            num_scalar_prefetch=0,
            grid=grid,
            in_specs=[
                pl.BlockSpec((tr, _LANES), lambda i: (i, 0)),
                pl.BlockSpec((tr, _LANES), lambda i: (i, 0)),
            ],
            out_specs=pl.BlockSpec((tr, _LANES), lambda i: (i, 0)),
        ),
        compiler_params=pltpu.CompilerParams(
            dimension_semantics=("parallel",),
            vmem_limit_bytes=vmem_limit,
        ),
    )(pred2d, target2d)

    if n_k == n:
        return out2d.reshape(orig_shape)

    # Ragged tail (< 128 + min_sub*128 elements): compute with plain jnp and
    # concatenate.  Only one small output copy; no full-input pad/copy.
    tail = _smooth_l1_jnp(pred_flat[n_k:], target_flat[n_k:], beta)
    return jnp.concatenate([out2d.reshape(-1), tail]).reshape(orig_shape)


class Bbox:
    """JAX/Pallas equivalent of the PyTorch Bbox module (no parameters)."""

    def __call__(self, pred, target):
        return smooth_l1_loss(pred, target)


def _ref_smooth_l1(pred, target, beta=1.0):
    diff = jnp.abs(pred.astype(jnp.float32) - target.astype(jnp.float32))
    out = jnp.where(diff < beta, 0.5 * diff * diff / beta, diff - 0.5 * beta)
    return out.astype(pred.dtype)


if __name__ == "__main__":
    key = jax.random.PRNGKey(0)
    model = Bbox()

    # Benchmark shape (NCHW as in the PyTorch spec) — fully aligned path,
    # 16 rows of 128 lanes, split into 2 "parallel" grid steps.
    k1, k2, k3, k4, k5, k6 = jax.random.split(key, 6)
    shape = (2, 4, 16, 16)
    pred = jax.random.normal(k1, shape, dtype=jnp.float32)
    target = jax.random.normal(k2, shape, dtype=jnp.float32)
    loss = model(pred, target)
    jax.block_until_ready(loss)
    assert loss.shape == shape
    assert jnp.allclose(loss, _ref_smooth_l1(pred, target), atol=1e-6, rtol=1e-6)

    # Medium ragged shape — kernel on the aligned (4, 128) prefix + jnp tail.
    shape2 = (4, 129)
    pred2 = jax.random.normal(k3, shape2, dtype=jnp.float32)
    target2 = jax.random.normal(k4, shape2, dtype=jnp.float32)
    loss2 = model(pred2, target2)
    jax.block_until_ready(loss2)
    assert loss2.shape == shape2
    assert jnp.allclose(loss2, _ref_smooth_l1(pred2, target2), atol=1e-6, rtol=1e-6)

    # Tiny shape (< 128 elements) — pure-XLA path by design.
    shape3 = (3, 5, 7)
    pred3 = jax.random.normal(k5, shape3, dtype=jnp.float32)
    target3 = jax.random.normal(k6, shape3, dtype=jnp.float32)
    loss3 = model(pred3, target3)
    jax.block_until_ready(loss3)
    assert loss3.shape == shape3
    assert jnp.allclose(loss3, _ref_smooth_l1(pred3, target3), atol=1e-6, rtol=1e-6)

    print("KERNEL_OK")
</pallas_src>

<mosaic_0001>
module attributes {stable_mosaic.version = 11 : i64} {
  func.func @kernel(%arg0: i32, %arg1: memref<8x128xf32, #tpu.memory_space<vmem>>, %arg2: memref<8x128xf32, #tpu.memory_space<vmem>>, %arg3: memref<8x128xf32, #tpu.memory_space<vmem>>) attributes {dimension_semantics = [#tpu.dimension_semantics<parallel>], iteration_bounds = array<i64: 2>, scalar_prefetch = 0 : i64, scratch_operands = 0 : i64, tpu.core_type = #tpu.core_type<tc>, window_params = [{transform_indices = @transform_0, window_bounds = array<i64: 8, 128>}, {transform_indices = @transform_1, window_bounds = array<i64: 8, 128>}, {transform_indices = @transform_2, window_bounds = array<i64: 8, 128>}]} {
    %c0 = arith.constant 0 : index
    %c0_0 = arith.constant 0 : index
    %0 = vector.load %arg1[%c0, %c0_0] : memref<8x128xf32, #tpu.memory_space<vmem>>, vector<8x128xf32>
    %c0_1 = arith.constant 0 : index
    %c0_2 = arith.constant 0 : index
    %1 = vector.load %arg2[%c0_1, %c0_2] : memref<8x128xf32, #tpu.memory_space<vmem>>, vector<8x128xf32>
    %2 = arith.subf %0, %1 : vector<8x128xf32>
    %3 = math.absf %2 : vector<8x128xf32>
    %cst = arith.constant 1.000000e+00 : f32
    %4 = vector.broadcast %cst : f32 to vector<8x128xf32>
    %5 = arith.cmpf olt, %3, %4 : vector<8x128xf32>
    %cst_3 = arith.constant 5.000000e-01 : f32
    %6 = vector.broadcast %cst_3 : f32 to vector<8x128xf32>
    %7 = arith.mulf %6, %3 : vector<8x128xf32>
    %8 = arith.mulf %7, %3 : vector<8x128xf32>
    %cst_4 = arith.constant 5.000000e-01 : f32
    %9 = vector.broadcast %cst_4 : f32 to vector<8x128xf32>
    %10 = arith.subf %3, %9 : vector<8x128xf32>
    %11 = arith.select %5, %8, %10 : vector<8x128xi1>, vector<8x128xf32>
    %c0_5 = arith.constant 0 : index
    %c0_6 = arith.constant 0 : index
    %12 = vector.load %arg3[%c0_5, %c0_6] : memref<8x128xf32, #tpu.memory_space<vmem>>, vector<8x128xf32>
    tpu.vector_store %arg3[%c0_5, %c0_6], %11 {strides = array<i32>} : memref<8x128xf32, #tpu.memory_space<vmem>>, vector<8x128xf32>,
    return
  }
  func.func @transform_0(%arg0: i32) -> (i32, i32) {
    %c0_i32 = arith.constant 0 : i32
    %c0_i32_0 = arith.constant 0 : i32
    return %arg0, %c0_i32 : i32, i32
  }
  func.func @transform_1(%arg0: i32) -> (i32, i32) {
    %c0_i32 = arith.constant 0 : i32
    %c0_i32_0 = arith.constant 0 : i32
    return %arg0, %c0_i32 : i32, i32
  }
  func.func @transform_2(%arg0: i32) -> (i32, i32) {
    %c0_i32 = arith.constant 0 : i32
    %c0_i32_0 = arith.constant 0 : i32
    return %arg0, %c0_i32 : i32, i32
  }
}

</mosaic_0001>

<bundles_post_ra>
// kernel: tpu_custom_call.1
= control target key start
LH: loop header
LB: loop body
LE: loop exit
PB: predicated region body
PF: predicated region fallthrough
CT: control target
= control target key end

     0   :  { %7 = vsyncpa [#allocation3], 0  ;;  %s739_s0 = inlined_call_operand.hbm [shape: f32[16,128], index: 0, kind: input, shape index: {}]   ;;  %s740_s1 = inlined_call_operand.hbm [shape: f32[16,128], index: 1, kind: input, shape index: {}]   ;;  %s741_s2 = inlined_call_operand.hbm [shape: f32[16,128], index: 2, kind: output, shape index: {}]  }
   0x1   :  { %9 = vsyncpa [#allocation3 + $0x1], 0 }
   0x2   :  { %10 = vsyncpa [#allocation6], 0 }
   0x3   :  { %12 = vsyncpa [#allocation6 + $0x1], 0 }
   0x4   :  { %13 = vsyncpa [#allocation4], 0 }
   0x5   :  { %15 = vsyncpa [#allocation4 + $0x1], 0  ;;  %s530_s9 = smov 0   ;;  %s532_s10 = smov 0  }
   0x6   :  { %s534_s11 = smov 0   ;;  %s536_s12 = smov 0  }
   0x7 LB: > { %s551_s13 = sadd.s32 4294967295, %s510_s12   ;;  %s313_s14 = sadd.s32 4294967294, %s510_s12   ;;  %s510_s12 = sphi %s536_s12, %s760_s12   ;;  %s506_s11 = sphi %s534_s11, %s759_s11   ;;  %s502_s10 = sphi %s532_s10, %s758_s10   ;;  %s498_s9 = sphi %s530_s9, %s757_s9  }
   0x8   : > { %s555_s15 = sadd.s32 1, %s510_s12   ;;  %s28_s16 = sadd.s32 1, %s506_s11 }
   0x9   : > { %s25_s17 = ssub.s32 %s510_s12, %s555_s15  ;;  %p35_p0 = scmp.ne.s32.totalorder %s506_s11, %s502_s10 }
   0xa   : > { %p26_p1 = scmp.eq.s32.totalorder %s25_s17, 0  ;;  %p36_p2 = scmp.eq.s32.totalorder %s510_s12, 0 }
   0xb   : > { %p41_p3 = scmp.ne.s32.totalorder %s502_s10, %s498_s9  ;;  %p42_p4 = scmp.eq.s32.totalorder %s551_s13, 0 }
   0xc   : > { %s567_s18 = scalar_select %p26_p1, %s506_s11, %s28_s16  }
   0xd   : > { %p569_p5 = por %p36_p2, %p35_p0  ;;  %p573_p6 = por %p42_p4, %p41_p3 }
   0xe   : > { %p91_p7 = scmp.eq.s32.totalorder %s551_s13, 1  ;;  %p97_p8 = scmp.eq.s32.totalorder %s313_s14, 1 }
   0xf   : > { %s745_s20 = scalar_select %p573_p6, 1, 0 }
  0x10   : > { %p346_p10 = scmp.lt.s32.totalorder %s510_s12, 2  ;;  %p580_p11 = por %p91_p7, %p35_p0 }
  0x11   : > { %p584_p12 = por %p97_p8, %p41_p3  ;;  %s589_s23 = sand.u32 1, %s506_s11  }
  0x12   : > { %s746_s21 = scalar_select %p580_p11, 1, 0 }
  0x13   : > { %s747_s22 = scalar_select %p584_p12, 1, 0 }
  0x14   : > { %s317_s24 = sshll.u32 %s510_s12, 7  ;;  %s316_s25 = sshll.u32 %s589_s23, 3 }
  0x15   : > { %s598_s28 = scalar_lea.hbm %s739_s0, %s317_s24  ;;  %s121_s29 = scalar_lea.vmem [#allocation2], %s316_s25 }
  0x16   : > { %s128_s30 = sshll.u32 %s121_s29, 4  ;;  %p604_p13 = pnand %p346_p10, %p569_p5  ;;  %s608_s30 = int_to_ptr.vmem [resolvable:$true] %s128_s30 }
  0x17   : > { %s118_s4 = scalar_lea.sflag [#allocation3], %s589_s23  ;;  %s380_s5 = scalar_lea.hbm %s598_s28, 128 }
  0x18   : > { %p381_p2 = scmp.ne.s32.totalorder %s598_s28, %s380_s5  ;;  %p382_p3 = pneg %p604_p13 }
  0x19   : > { %s385_s8 = scalar_lea.hbm %s739_s0, 256  ;;  %p386_p5 = scmp.lt.u32.totalorder %s598_s28, %s739_s0 }
  0x1a   : > { %p383_p4 = pnand %p382_p3, %p381_p2  ;;  %p387_p8 = scmp.lt.u32.totalorder %s385_s8, %s380_s5 }
  0x1b   : > { %p389_p9 = scmp.lt.u32.totalorder %s380_s5, %s598_s28 }
  0x1c   : > { %p384_p7 = pneg %p383_p4  ;;  %p388_p10 = por %p387_p8, %p386_p5 }
  0x1e   : > { %p390_p0 = por %p389_p9, %p388_p10 }
  0x20   : > { %p391_p1 = pnand %p390_p0, %p384_p7 }
  0x22   : > { %394 = shalt.err (!%p391_p1)
}
  0x23   : > { %s395_s17 = scalar_lea.vmem %s608_s30, 128  ;;  %s512_s19 = smov [#allocation2]  }
  0x24   : > { %p396_p2 = scmp.ne.s32.totalorder %s608_s30, %s395_s17  ;;  %s400_s26 = sshll.u32 %s512_s19, 4  ;;  %s401_s26 = int_to_ptr.vmem [resolvable:$false] %s400_s26 }
  0x25   : > { %s402_s27 = scalar_lea.vmem %s401_s26, 256  ;;  %p403_p11 = scmp.lt.s32.totalorder %s608_s30, %s401_s26 }
  0x26   : > { %p398_p4 = pnand %p396_p2, %p382_p3  ;;  %p404_p5 = scmp.lt.s32.totalorder %s402_s27, %s395_s17 }
  0x28   : > { %p399_p12 = pneg %p398_p4  ;;  %p405_p8 = por %p404_p5, %p403_p11 }
  0x2a   : > { %p406_p9 = pnand %p405_p8, %p399_p12 }
  0x2c   : > { %409 = shalt.err (!%p406_p9)
}
  0x2d   : > { %338 = dma.hbm_to_vmem [thread:$0]  (!%p604_p13), %s598_s28, 128, %s608_s30, %s118_s4  }
  0x2e   : > { %p749_p0 = scmp.lt.s32.totalorder %s510_s12, 3  ;;  %p750_p1 = scmp.ge.s32.totalorder %s510_s12, 1 }
  0x2f   : > { %s651_s7 = scalar_lea.hbm %s740_s1, %s317_s24  ;;  %s139_s8 = scalar_lea.vmem [#allocation5], %s316_s25 }
  0x30   : > { %p642_p7 = pnand %p750_p1, %p749_p0  ;;  %s146_s14 = sshll.u32 %s139_s8, 4  ;;  %s147_s14 = int_to_ptr.vmem [resolvable:$true] %s146_s14 }
  0x31   : > { %s136_s28 = scalar_lea.sflag [#allocation6], %s589_s23  ;;  %s410_s30 = scalar_lea.hbm %s651_s7, 128 }
  0x32   : > { %s751_s29 = scalar_select %p642_p7, 1, 0 }
  0x33   : > { %p411_p11 = scmp.ne.s32.totalorder %s651_s7, %s410_s30  ;;  %s415_s24 = scalar_lea.hbm %s740_s1, 256 }
  0x34   : > { %p416_p2 = scmp.lt.u32.totalorder %s651_s7, %s740_s1  ;;  %p417_p4 = scmp.lt.u32.totalorder %s415_s24, %s410_s30 }
  0x35   : > { %p413_p12 = pnand %p411_p11, %p382_p3  ;;  %p419_p8 = scmp.lt.u32.totalorder %s410_s30, %s651_s7 }
  0x36   : > { %p418_p5 = por %p417_p4, %p416_p2 }
  0x37   : > { %p414_p10 = pneg %p413_p12 }
  0x38   : > { %p420_p9 = por %p419_p8, %p418_p5 }
  0x3a   : > { %p421_p0 = pnand %p420_p9, %p414_p10 }
  0x3c   : > { %424 = shalt.err (!%p421_p0)
}
  0x3d   : > { %s425_s23 = scalar_lea.vmem %s147_s14, 128  ;;  %s513_s25 = smov [#allocation5]  }
  0x3e   : > { %p426_p1 = scmp.ne.s32.totalorder %s147_s14, %s425_s23  ;;  %s430_s26 = sshll.u32 %s513_s25, 4  ;;  %s431_s26 = int_to_ptr.vmem [resolvable:$false] %s430_s26 }
  0x3f   : > { %s432_s27 = scalar_lea.vmem %s431_s26, 256  ;;  %p433_p6 = scmp.lt.s32.totalorder %s147_s14, %s431_s26 }
  0x40   : > { %p428_p11 = pnand %p426_p1, %p382_p3  ;;  %p434_p7 = scmp.lt.s32.totalorder %s432_s27, %s425_s23 }
  0x42   : > { %p429_p12 = pneg %p428_p11  ;;  %p435_p2 = por %p434_p7, %p433_p6 }
  0x44   : > { %p436_p4 = pnand %p435_p2, %p429_p12 }
  0x46   : > { %439 = shalt.err (!%p436_p4)
}
  0x47   : > { %341 = dma.hbm_to_vmem [thread:$0]  (!%p604_p13), %s651_s7, 128, %s147_s14, %s136_s28  }
  0x48   : > { %p752_p10 = scmp.ne.s32.totalorder %s751_s29, 0 }
  0x49   : > { %s678_s5 = sand.u32 (!%p752_p10), 1, %s502_s10   ;;  %p753_p3 = scmp.ne.s32.totalorder (!%p752_p10), %s745_s20, 0 }
  0x4a   : > { %155 = sbr.rel (%p752_p10) target bundleno = 110 (0x6e), region = 28  ;;  %s321_s6 = sshll.u32 (!%p752_p10), %s678_s5, 3 }
  0x4b   : > { %s158_s8 = scalar_lea.sflag (!%p752_p10), [#allocation3], %s678_s5  ;;  %s161_s30 = scalar_lea.vmem (!%p752_p10), [#allocation2], %s321_s6 }
  0x51   : > { %485 = dma.done.wait (%p753_p3), %s158_s8, 128  }
  0x52   : > { %487 = vsyncadd (%p753_p3), %s158_s8, 4294967168  ;;  %s167_s3 = scalar_lea.sflag [#allocation6], %s678_s5  ;;  %s170_s7 = scalar_lea.vmem [#allocation5], %s321_s6 }
  0x53   : > { %489 = dma.done.wait (%p753_p3), %s167_s3, 128  }
  0x54   : > { %491 = vsyncadd (%p753_p3), %s167_s3, 4294967168  ;;  %v196_v0 = vld [vmem:[%s161_s30] sm:$0xff]  ;;  %v197_v1 = vld [vmem:[%s170_s7] sm:$0xff]  ;;  %s195_s29 = scalar_lea.vmem [#allocation7], %s321_s6  ;;  %s326_s28 = sshll.u32 %s551_s13, 7 }
  0x55   : > { %v198_v2 = vsub.f32 %v196_v0, %v197_v1  ;;  %s220_s14 = sshll.u32 %s195_s29, 4  ;;  %s697_s20 = scalar_lea.hbm %s741_s2, %s326_s28  ;;  %s692_s14 = int_to_ptr.vmem [resolvable:$true] %s220_s14 }
  0x56   : > { %s207_s24 = scalar_lea.sflag [#allocation4], %s678_s5  ;;  %s440_s17 = scalar_lea.vmem %s692_s14, 128 }
  0x57   : > { %v199_v3 = vand.u32 2147483647, %v198_v2  ;;  %p441_p6 = scmp.ne.s32.totalorder %s692_s14, %s440_s17  ;;  %p754_p13 = scmp.ne.s32.totalorder %s746_s21, 0 }
  0x58   : > { %s514_s13 = smov [#allocation7]  }
  0x59   : > { %v201_v4 = vmul.f32 0.5, %v199_v3  ;;  %v324_v5 = vadd.f32 -0.5, %v199_v3  ;;  %vm200_vm0 = vcmp.lt.f32.partialorder %v199_v3, 1.0  ;;  %p442_p7 = pnand %p441_p6, %p754_p13  ;;  %s444_s19 = sshll.u32 %s514_s13, 4  ;;  %s445_s19 = int_to_ptr.vmem [resolvable:$false] %s444_s19 }
  0x5a   : > { %s446_s23 = scalar_lea.vmem %s445_s19, 256  ;;  %p447_p8 = scmp.lt.s32.totalorder %s692_s14, %s445_s19 }
  0x5b   : > { %v202_v6 = vmul.f32 %v201_v4, %v199_v3  ;;  %p443_p5 = pneg %p442_p7  ;;  %p448_p9 = scmp.lt.s32.totalorder %s446_s23, %s440_s17 }
  0x5d   : > { %v204_v7 = vsel %vm200_vm0, %v202_v6, %v324_v5  ;;  %p449_p0 = por %p448_p9, %p447_p8 }
  0x5e   : > { %205 = vst [vmem:[%s195_s29] sm:$0xff] %v204_v7 }
  0x5f   : > { %p450_p1 = pnand %p449_p0, %p443_p5 }
  0x61   : > { %453 = shalt.err (!%p450_p1)
}
  0x62   : > { %s454_s25 = scalar_lea.hbm %s697_s20, 128  ;;  %s458_s5 = scalar_lea.hbm %s741_s2, 256 }
  0x63   : > { %p455_p11 = scmp.ne.s32.totalorder %s697_s20, %s454_s25  ;;  %p459_p4 = scmp.lt.u32.totalorder %s697_s20, %s741_s2 }
  0x64   : > { %p460_p10 = scmp.lt.u32.totalorder %s458_s5, %s454_s25  ;;  %p462_p6 = scmp.lt.u32.totalorder %s454_s25, %s697_s20 }
  0x65   : > { %p456_p12 = pnand %p455_p11, %p754_p13 }
  0x66   : > { %p461_p3 = por %p460_p10, %p459_p4 }
  0x67   : > { %p457_p2 = pneg %p456_p12 }
  0x68   : > { %p463_p7 = por %p462_p6, %p461_p3 }
  0x6a   : > { %p464_p5 = pnand %p463_p7, %p457_p2 }
  0x6c   : > { %467 = shalt.err (!%p464_p5)
}
  0x6d   : > { %333 = dma.vmem_to_hbm [thread:$0]  (%p754_p13), %s692_s14, 128, %s697_s20, %s207_s24  }
  0x6e PF: > { %s232_s30 = sand.u32 1, %s498_s9   ;;  %p755_p8 = scmp.ne.s32.totalorder %s747_s22, 0 }
  0x6f   : > { %p756_p9 = scmp.ge.s32.totalorder %s510_s12, 2  ;;  %s233_s3 = scalar_lea.sflag [#allocation4], %s232_s30 }
  0x71   : > { %p343_p0 = pnand %p756_p9, %p755_p8 }
  0x73   : > { %493 = dma.done.wait (!%p343_p0), %s233_s3, 128  }
  0x74   : > { %495 = vsyncadd (!%p343_p0), %s233_s3, 4294967168  ;;  %p18_p1 = scmp.ge.s32.totalorder %s555_s15, 4   ;;  %s757_s9 = smov %s502_s10 }
  0x75   : > { %s758_s10 = smov %s506_s11  ;;  %s759_s11 = smov %s567_s18 }
  0x76   : > { %s760_s12 = smov %s555_s15  ;;  %20 = sbr.rel (!%p18_p1) target bundleno = 7 (0x7), region = 86 }
  0x7d   :  { %238 = vsyncpa [#allocation3], 1 }
  0x7e   :  { %240 = vsyncpa [#allocation3 + $0x1], 1 }
  0x7f   :  { %241 = vsyncpa [#allocation6], 1 }
  0x80   :  { %243 = vsyncpa [#allocation6 + $0x1], 1 }
  0x81   :  { %244 = vsyncpa [#allocation4], 1 }
  0x82   :  { %246 = vsyncpa [#allocation4 + $0x1], 1 }

</bundles_post_ra>
